<compile_context>
chip_gen: v7x
topology: tpu7x:2x2x1
jax: 0.10.0
libtpu: 0.0.40
codegen_flags: <defaults>
</compile_context>

<pallas_src>
import functools

import jax
import jax.numpy as jnp
from jax.experimental import pallas as pl
from jax.experimental.pallas import tpu as pltpu


def _round_up(x, m):
    return (x + m - 1) // m * m


def _metaformer_kernel(x_ref, vc_ref, b1_ref, w1_ref, w2_ref, o_ref):
    # x_ref : (tm, C)       tile of the flattened [B*H*W, C] input (f32)
    # vc_ref: (3, C)        packed per-channel vectors [a; b0; b2'] (f32)
    # b1_ref: (1, hidden)   folded fc1 bias (f32)
    # w1_ref: (C, hidden)   folded fc1 weight (bf16)
    # w2_ref: (hidden, C)   folded fc2 weight (bf16)
    x = x_ref[...].astype(jnp.float32)

    a = vc_ref[0:1, :]
    b0 = vc_ref[1:2, :]
    b2 = vc_ref[2:3, :]

    # branch 1 (token_mixer=Identity; norm1 + LayerScale folded): y1 = x*a + b0
    y1 = x * a + b0

    # branch 2: y1 + relu(y1 @ w1' + b1') @ w2' + b2'
    h = jnp.dot(y1.astype(jnp.bfloat16), w1_ref[...],
                preferred_element_type=jnp.float32) + b1_ref[...]
    h = jnp.maximum(h, 0.0).astype(jnp.bfloat16)          # ReLU; bf16 for MXU
    m = jnp.dot(h, w2_ref[...], preferred_element_type=jnp.float32)

    o_ref[...] = (y1 + m + b2).astype(o_ref.dtype)


def metaformer_block(x_nchw, params, *, tile_m=1024, single_buffer_weights=False):
    """x_nchw: [B, C, H, W] float32.  Returns [B, C, H, W]."""
    B, C, H, W = x_nchw.shape
    f32 = jnp.float32

    n1s = params["n1_scale"].astype(f32)
    n1b = params["n1_bias"].astype(f32)
    n2s = params["n2_scale"].astype(f32)
    n2b = params["n2_bias"].astype(f32)
    ls1 = params["ls1"].astype(f32)
    ls2 = params["ls2"].astype(f32)
    w1 = params["fc1_w"].astype(f32)
    b1 = params["fc1_b"].astype(f32)
    w2 = params["fc2_w"].astype(f32)
    b2 = params["fc2_b"].astype(f32)
    hidden = w1.shape[1]

    # ---- host-side folding of norm/LayerScale into the 1x1-conv weights ----
    a = 1.0 + ls1 * n1s                        # y1 = x*a + b0
    b0 = ls1 * n1b
    w1p = (n2s[:, None] * w1).astype(jnp.bfloat16)     # norm2 scale -> fc1 rows
    b1p = (n2b @ w1 + b1).reshape(1, hidden)           # norm2 bias  -> fc1 bias
    w2p = (w2 * ls2[None, :]).astype(jnp.bfloat16)     # ls2 -> fc2 columns
    b2p = ls2 * b2                                     # ls2 -> fc2 bias
    vecs_c = jnp.stack([a, b0, b2p], axis=0)           # (3, C) single DMA

    # NCHW -> channels-last, flatten batch+spatial.
    # NOTE: in a full channels-last model these transposes (a full HBM
    # round-trip each) should be hoisted out and the block fed NHWC directly.
    x2d = jnp.transpose(x_nchw, (0, 2, 3, 1)).reshape(B * H * W, C)
    M = x2d.shape[0]

    # ---- tile selection (multiple of 8 sublanes; 256-aligned when split) ----
    tm = _round_up(min(tile_m, _round_up(M, 8)), 8)
    # keep >=2 grid steps when the problem is big enough (v7x: 2 TensorCores)
    if M >= 512 and M // tm < 2:
        tm = _round_up(pl.cdiv(M, 2), 256)
    Mp = _round_up(M, tm)
    if Mp != M:
        x2d = jnp.pad(x2d, ((0, Mp - M), (0, 0)))
    grid = Mp // tm

    # ---- VMEM budget (explicit; v7x physical cap is 64 MiB) ----
    w_bufs = 1 if single_buffer_weights else 2
    est_vmem = (
        2 * tm * C * 4                     # input tile, double-buffered f32
        + 2 * tm * C * 4                   # output tile, double-buffered f32
        + w_bufs * (C * hidden + hidden * C) * 2   # bf16 weights
        + tm * hidden * (4 + 2)            # f32 + bf16 MLP intermediate
        + tm * C * 4                       # y1 temporary
        + (3 * C + hidden) * 4 * 2         # small per-channel vectors
    )
    vmem_limit = int(min(max(2 * est_vmem, 32 << 20), 64 << 20))

    def _w_spec(shape):
        if single_buffer_weights:
            # grid-invariant weights: a single resident buffer is enough
            return pl.BlockSpec(shape, lambda i: (0, 0),
                                pipeline_mode=pl.Buffered(1))
        return pl.BlockSpec(shape, lambda i: (0, 0))

    flops = 2 * Mp * C * hidden * 2 + 8 * Mp * C       # two matmuls + affines
    bytes_accessed = (2 * Mp * C * 4                   # x in + out
                      + 2 * C * hidden * 2             # bf16 weights
                      + (3 * C + hidden) * 4)
    cost = pl.CostEstimate(flops=int(flops), transcendentals=0,
                           bytes_accessed=int(bytes_accessed))

    out2d = pl.pallas_call(
        _metaformer_kernel,
        out_shape=jax.ShapeDtypeStruct((Mp, C), x2d.dtype),
        grid_spec=pltpu.PrefetchScalarGridSpec(
            num_scalar_prefetch=0,
            grid=(grid,),
            in_specs=[
                pl.BlockSpec((tm, C), lambda i: (i, 0)),      # x tile
                pl.BlockSpec((3, C), lambda i: (0, 0)),       # packed vectors
                pl.BlockSpec((1, hidden), lambda i: (0, 0)),  # folded fc1 bias
                _w_spec((C, hidden)),                         # fc1 weight bf16
                _w_spec((hidden, C)),                         # fc2 weight bf16
            ],
            out_specs=pl.BlockSpec((tm, C), lambda i: (i, 0)),
        ),
        compiler_params=pltpu.CompilerParams(
            dimension_semantics=("parallel",),
            vmem_limit_bytes=vmem_limit),
        cost_estimate=cost,
    )(x2d, vecs_c, b1p, w1p, w2p)

    if Mp != M:
        out2d = out2d[:M]

    # [B*H*W, C] -> NCHW
    return jnp.transpose(out2d.reshape(B, H, W, C), (0, 3, 1, 2))


def make_params(key, dim, mlp_ratio=4.0, layer_scale_init_value=1e-5, eps=1e-5):
    hidden = int(dim * mlp_ratio)
    ks = jax.random.split(key, 12)

    # BatchNorm2d (eval): y = gamma * (x - mean) / sqrt(var + eps) + beta
    def bn(kg, kb, km, kv):
        gamma = jax.random.normal(kg, (dim,), jnp.float32) * 0.1 + 1.0
        beta = jax.random.normal(kb, (dim,), jnp.float32) * 0.1
        mean = jax.random.normal(km, (dim,), jnp.float32) * 0.1
        var = jax.random.uniform(kv, (dim,), jnp.float32, 0.5, 1.5)
        scale = gamma / jnp.sqrt(var + eps)
        bias = beta - mean * scale
        return scale, bias

    n1_scale, n1_bias = bn(ks[0], ks[1], ks[2], ks[3])
    n2_scale, n2_bias = bn(ks[4], ks[5], ks[6], ks[7])

    # 1x1 convs: weight (out, in, 1, 1) -> stored as (in, out) for matmul
    fc1_w = jax.random.normal(ks[8], (dim, hidden), jnp.float32) * 0.1
    fc1_b = jax.random.normal(ks[9], (hidden,), jnp.float32) * 0.1
    fc2_w = jax.random.normal(ks[10], (hidden, dim), jnp.float32) * 0.1
    fc2_b = jax.random.normal(ks[11], (dim,), jnp.float32) * 0.1

    ls1 = jnp.full((dim,), layer_scale_init_value, jnp.float32)
    ls2 = jnp.full((dim,), layer_scale_init_value, jnp.float32)

    return dict(n1_scale=n1_scale, n1_bias=n1_bias,
                n2_scale=n2_scale, n2_bias=n2_bias,
                fc1_w=fc1_w, fc1_b=fc1_b, fc2_w=fc2_w, fc2_b=fc2_b,
                ls1=ls1, ls2=ls2)


def reference(x_nchw, p):
    # pure-JAX f32 reference in NCHW, mirroring the PyTorch forward
    def affine(x, s, b):
        return x * s[None, :, None, None] + b[None, :, None, None]

    def conv1x1(x, w, b):  # w: (in, out)
        y = jnp.einsum("bchw,co->bohw", x, w)
        return y + b[None, :, None, None]

    y1 = x_nchw + p["ls1"][None, :, None, None] * affine(x_nchw, p["n1_scale"], p["n1_bias"])
    n2 = affine(y1, p["n2_scale"], p["n2_bias"])
    h = jnp.maximum(conv1x1(n2, p["fc1_w"], p["fc1_b"]), 0.0)
    m = conv1x1(h, p["fc2_w"], p["fc2_b"])
    return y1 + p["ls2"][None, :, None, None] * m


if __name__ == "__main__":
    B, C, H, W = 2, 4, 16, 16
    key = jax.random.PRNGKey(0)
    kx, kp = jax.random.split(key)
    x = jax.random.normal(kx, (B, C, H, W), jnp.float32)
    params = make_params(kp, dim=C, mlp_ratio=4.0)

    fn = jax.jit(functools.partial(metaformer_block, tile_m=1024))
    out = jax.block_until_ready(fn(x, params))

    ref = reference(x, params)
    assert out.shape == (B, C, H, W)
    max_err = float(jnp.max(jnp.abs(out - ref)))
    assert jnp.allclose(out, ref, atol=1e-5, rtol=1e-5), max_err
    print("KERNEL_OK")
</pallas_src>

<mosaic_0001>
module attributes {stable_mosaic.version = 11 : i64} {
  func.func @_metaformer_kernel(%arg0: i32, %arg1: memref<256x4xf32, #tpu.memory_space<vmem>>, %arg2: memref<3x4xf32, #tpu.memory_space<vmem>>, %arg3: memref<1x16xf32, #tpu.memory_space<vmem>>, %arg4: memref<4x16xbf16, #tpu.memory_space<vmem>>, %arg5: memref<16x4xbf16, #tpu.memory_space<vmem>>, %arg6: memref<256x4xf32, #tpu.memory_space<vmem>>) attributes {dimension_semantics = [#tpu.dimension_semantics<parallel>], iteration_bounds = array<i64: 2>, scalar_prefetch = 0 : i64, scratch_operands = 0 : i64, tpu.core_type = #tpu.core_type<tc>, window_params = [{transform_indices = @transform_0, window_bounds = array<i64: 256, 4>}, {pipeline_mode = #tpu.pipeline_mode<synchronous>, transform_indices = @transform_1, window_bounds = array<i64: 3, 4>}, {pipeline_mode = #tpu.pipeline_mode<synchronous>, transform_indices = @transform_2, window_bounds = array<i64: 1, 16>}, {pipeline_mode = #tpu.pipeline_mode<synchronous>, transform_indices = @transform_3, window_bounds = array<i64: 4, 16>}, {pipeline_mode = #tpu.pipeline_mode<synchronous>, transform_indices = @transform_4, window_bounds = array<i64: 16, 4>}, {transform_indices = @transform_5, window_bounds = array<i64: 256, 4>}]} {
    %c0 = arith.constant 0 : index
    %c0_0 = arith.constant 0 : index
    %0 = vector.load %arg1[%c0, %c0_0] : memref<256x4xf32, #tpu.memory_space<vmem>>, vector<256x4xf32>
    %c0_1 = arith.constant 0 : index
    %c0_2 = arith.constant 0 : index
    %1 = vector.load %arg2[%c0_1, %c0_2] : memref<3x4xf32, #tpu.memory_space<vmem>>, vector<1x4xf32>
    %c1 = arith.constant 1 : index
    %c0_3 = arith.constant 0 : index
    %2 = vector.load %arg2[%c1, %c0_3] : memref<3x4xf32, #tpu.memory_space<vmem>>, vector<1x4xf32>
    %c2 = arith.constant 2 : index
    %c0_4 = arith.constant 0 : index
    %3 = vector.load %arg2[%c2, %c0_4] : memref<3x4xf32, #tpu.memory_space<vmem>>, vector<1x4xf32>
    %4 = vector.broadcast %1 : vector<1x4xf32> to vector<256x4xf32>
    %5 = arith.mulf %0, %4 : vector<256x4xf32>
    %6 = vector.broadcast %2 : vector<1x4xf32> to vector<256x4xf32>
    %7 = arith.addf %5, %6 : vector<256x4xf32>
    %8 = arith.truncf %7 : vector<256x4xf32> to vector<256x4xbf16>
    %c0_5 = arith.constant 0 : index
    %c0_6 = arith.constant 0 : index
    %9 = vector.load %arg4[%c0_5, %c0_6] : memref<4x16xbf16, #tpu.memory_space<vmem>>, vector<4x16xbf16>
    %cst = arith.constant dense<0.000000e+00> : vector<256x16xf32>
    %10 = tpu.matmul %8, %9, %cst {dimension_numbers = #tpu.dot_dimension_numbers<[1], [0], [0], [1], [0, 0, 1, 1], [], []>} : vector<256x4xbf16>, vector<4x16xbf16>, vector<256x16xf32> -> vector<256x16xf32>
    %c0_7 = arith.constant 0 : index
    %c0_8 = arith.constant 0 : index
    %11 = vector.load %arg3[%c0_7, %c0_8] : memref<1x16xf32, #tpu.memory_space<vmem>>, vector<1x16xf32>
    %12 = vector.broadcast %11 : vector<1x16xf32> to vector<256x16xf32>
    %13 = arith.addf %10, %12 : vector<256x16xf32>
    %cst_9 = arith.constant 0.000000e+00 : f32
    %14 = vector.broadcast %cst_9 : f32 to vector<256x16xf32>
    %15 = arith.maximumf %13, %14 : vector<256x16xf32>
    %16 = arith.truncf %15 : vector<256x16xf32> to vector<256x16xbf16>
    %c0_10 = arith.constant 0 : index
    %c0_11 = arith.constant 0 : index
    %17 = vector.load %arg5[%c0_10, %c0_11] : memref<16x4xbf16, #tpu.memory_space<vmem>>, vector<16x4xbf16>
    %cst_12 = arith.constant dense<0.000000e+00> : vector<256x4xf32>
    %18 = tpu.matmul %16, %17, %cst_12 {dimension_numbers = #tpu.dot_dimension_numbers<[1], [0], [0], [1], [0, 0, 1, 1], [], []>} : vector<256x16xbf16>, vector<16x4xbf16>, vector<256x4xf32> -> vector<256x4xf32>
    %19 = arith.addf %7, %18 : vector<256x4xf32>
    %20 = vector.broadcast %3 : vector<1x4xf32> to vector<256x4xf32>
    %21 = arith.addf %19, %20 : vector<256x4xf32>
    %c0_13 = arith.constant 0 : index
    %c0_14 = arith.constant 0 : index
    %22 = vector.load %arg6[%c0_13, %c0_14] : memref<256x4xf32, #tpu.memory_space<vmem>>, vector<256x4xf32>
    tpu.vector_store %arg6[%c0_13, %c0_14], %21 {strides = array<i32>} : memref<256x4xf32, #tpu.memory_space<vmem>>, vector<256x4xf32>,
    return
  }
  func.func @transform_0(%arg0: i32) -> (i32, i32) {
    %c0_i32 = arith.constant 0 : i32
    %c0_i32_0 = arith.constant 0 : i32
    return %arg0, %c0_i32 : i32, i32
  }
  func.func @transform_1(%arg0: i32) -> (i32, i32) {
    %c0_i32 = arith.constant 0 : i32
    %c0_i32_0 = arith.constant 0 : i32
    %c0_i32_1 = arith.constant 0 : i32
    return %c0_i32, %c0_i32_0 : i32, i32
  }
  func.func @transform_2(%arg0: i32) -> (i32, i32) {
    %c0_i32 = arith.constant 0 : i32
    %c0_i32_0 = arith.constant 0 : i32
    %c0_i32_1 = arith.constant 0 : i32
    return %c0_i32, %c0_i32_0 : i32, i32
  }
  func.func @transform_3(%arg0: i32) -> (i32, i32) {
    %c0_i32 = arith.constant 0 : i32
    %c0_i32_0 = arith.constant 0 : i32
    %c0_i32_1 = arith.constant 0 : i32
    return %c0_i32, %c0_i32_0 : i32, i32
  }
  func.func @transform_4(%arg0: i32) -> (i32, i32) {
    %c0_i32 = arith.constant 0 : i32
    %c0_i32_0 = arith.constant 0 : i32
    %c0_i32_1 = arith.constant 0 : i32
    return %c0_i32, %c0_i32_0 : i32, i32
  }
  func.func @transform_5(%arg0: i32) -> (i32, i32) {
    %c0_i32 = arith.constant 0 : i32
    %c0_i32_0 = arith.constant 0 : i32
    return %arg0, %c0_i32 : i32, i32
  }
}

</mosaic_0001>

<bundles_post_ra>
// kernel: metaformer_block.1
= control target key start
LH: loop header
LB: loop body
LE: loop exit
PB: predicated region body
PF: predicated region fallthrough
CT: control target
= control target key end

     0   :  { %s1194_s18 = smov 0   ;;  %s1632_s0 = inlined_call_operand.vmem [shape: f32[512,4], index: 0, kind: input, shape index: {}]   ;;  %s1633_s1 = inlined_call_operand.vmem [shape: f32[3,4], index: 1, kind: input, shape index: {}]   ;;  %s1634_s2 = inlined_call_operand.vmem [shape: f32[1,16], index: 2, kind: input, shape index: {}]   ;;  %s1635_s3 = inlined_call_operand.vmem [shape: bf16[4,16], index: 3, kind: input, shape index: {}]   ;;  %s1636_s4 = inlined_call_operand.vmem [shape: bf16[16,4], index: 4, kind: input, shape index: {}]   ;;  %s1637_s5 = inlined_call_operand.vmem [shape: f32[512,4], index: 5, kind: output, shape index: {}]  }
   0x1 LB: > { %s996_s19 = sadd.s32 4294967295, %s1162_s18   ;;  %p1000_p0 = scmp.ge.s32.totalorder %s1162_s18, 1  ;;  %s1162_s18 = sphi %s1194_s18, %s15_s18  }
   0x2   : > { %p188_p1 = scmp.lt.s32.totalorder %s1162_s18, 3 }
   0x4   : > { %p189_p2 = pnand %p1000_p0, %p188_p1 }
   0x5   : > { %v352_v0 = vld [vmem:[%s1635_s3] sm:$0x3] (!%p189_p2)  ;;  %vm409_vm0 = vcmask (!%p189_p2), 1041408   ;;  %s1001_s22 = sshll.u32 (!%p189_p2), %s996_s19, 5  ;;  %vm360_vm1 = vcmask (!%p189_p2), 31744   ;;  %vm630_vm2 = vcmask (!%p189_p2), 130048  }
   0x6   : > { %192 = sbr.rel (%p189_p2) target bundleno = 522 (0x20a), region = 40  ;;  %1146 = vmatprep.subr.msk.bf16.mxu0 (!%p189_p2), %vm409_vm0, %v352_v0  ;;  %v411_v1 = vsel (!%p189_p2), %vm409_vm0, %v352_v0, 0  ;;  %p217_p3 = scmp.lt.s32.totalorder (!%p189_p2), %s1001_s22, 63  ;;  %v1211_v2 = vld [vmem:[%s1633_s1] ss:$0 sm:$0xff] (!%p189_p2) }
   0x7   : > { %1079 = vmatpush3.bf16.msra.mxu0 (!%p189_p2), %v411_v1  ;;  %v1223_v3 = vld [vmem:[%s1633_s1 + $0x1] ss:$0 sm:$0xff] (!%p189_p2) }
   0xd   : > { %s1639_s22 = smov (!%p217_p3, %s1001_s22), 63 }
   0xe   : > { %s1002_s23 = sshll.u32 %s1639_s22, 3 }
   0xf   : > { %s1218_s28 = scalar_lea.vmem %s1632_s0, %s1002_s23  ;;  %s1500_s14 = scalar_lea.vmem %s1637_s5, %s1002_s23 }
  0x10   : > { %v229_v4 = vld [vmem:[%s1218_s28] sm:$0xff]  ;;  %v230_v5 = vld [vmem:[%s1218_s28 + $0x8] sm:$0xff]  ;;  %v231_v6 = vld [vmem:[%s1218_s28 + $0x10] sm:$0xff] }
  0x11   : > { %v268_v7 = vmul.f32 %v1211_v2, %v229_v4  ;;  %v269_v8 = vmul.f32 %v1211_v2, %v230_v5  ;;  %v232_v9 = vld [vmem:[%s1218_s28 + $0x18] sm:$0xff]  ;;  %v270_v10 = vmul.f32 %v1211_v2, %v231_v6  ;;  %v233_v11 = vld [vmem:[%s1218_s28 + $0x20] sm:$0xff]  ;;  %v234_v12 = vld [vmem:[%s1218_s28 + $0x28] sm:$0xff] }
  0x12   : > { %v271_v13 = vmul.f32 %v1211_v2, %v232_v9  ;;  %v272_v14 = vmul.f32 %v1211_v2, %v233_v11  ;;  %v273_v15 = vmul.f32 %v1211_v2, %v234_v12  ;;  %v235_v16 = vld [vmem:[%s1218_s28 + $0x30] sm:$0xff]  ;;  %v236_v17 = vld [vmem:[%s1218_s28 + $0x38] sm:$0xff]  ;;  %v237_v18 = vld [vmem:[%s1218_s28 + $0x40] sm:$0xff] }
  0x13   : > { %v1241_v19 = vadd.f32 %v1223_v3, %v268_v7  ;;  %v1244_v20 = vadd.f32 %v1223_v3, %v269_v8  ;;  %v1247_v21 = vadd.f32 %v1223_v3, %v270_v10  ;;  %v274_v22 = vmul.f32 %v1211_v2, %v235_v16  ;;  %v238_v23 = vld [vmem:[%s1218_s28 + $0x48] sm:$0xff]  ;;  %v239_v37 = vld [vmem:[%s1218_s28 + $0x50] sm:$0xff]  ;;  %v240_v38 = vld [vmem:[%s1218_s28 + $0x58] sm:$0xff] }
  0x14   : > { %v1252_v24 = vadd.f32 %v1223_v3, %v271_v13  ;;  %v1255_v25 = vadd.f32 %v1223_v3, %v272_v14  ;;  %v1258_v26 = vadd.f32 %v1223_v3, %v273_v15  ;;  %v275_v27 = vmul.f32 %v1211_v2, %v236_v17  ;;  %v241_v39 = vld [vmem:[%s1218_s28 + $0x60] sm:$0xff]  ;;  %v242_v40 = vld [vmem:[%s1218_s28 + $0x68] sm:$0xff]  ;;  %v243_v51 = vld [vmem:[%s1218_s28 + $0x70] sm:$0xff] }
  0x15   : > { %v336_v28 = vpack.c.bf16 %v1244_v20, %v1241_v19  ;;  %v276_v29 = vmul.f32 %v1211_v2, %v237_v18  ;;  %v277_v30 = vmul.f32 %v1211_v2, %v238_v23  ;;  %v1272_v33 = vadd.f32 %v1223_v3, %v274_v22  ;;  %v244_v52 = vld [vmem:[%s1218_s28 + $0x78] sm:$0xff]  ;;  %v245_v53 = vld [vmem:[%s1218_s28 + $0x80] sm:$0xff]  ;;  %v246_v54 = vld [vmem:[%s1218_s28 + $0x88] sm:$0xff] }
  0x16   : > { %v337_v31 = vpack.c.bf16 %v1252_v24, %v1247_v21  ;;  %v338_v32 = vpack.c.bf16 %v1258_v26, %v1255_v25  ;;  %v1275_v34 = vadd.f32 %v1223_v3, %v275_v27  ;;  %v278_v42 = vmul.f32 %v1211_v2, %v239_v37  ;;  %v247_v1 = vld [vmem:[%s1218_s28 + $0x90] sm:$0xff]  ;;  %v248_v4 = vld [vmem:[%s1218_s28 + $0x98] sm:$0xff]  ;;  %v249_v5 = vld [vmem:[%s1218_s28 + $0xa0] sm:$0xff] }
  0x17   : > { %1080 = vmatprep.mubr.msk.bf16.mxu0 %vm360_vm1, %v336_v28  ;;  %v1279_v35 = vadd.f32 %v1223_v3, %v276_v29  ;;  %v1282_v36 = vadd.f32 %v1223_v3, %v277_v30  ;;  %v279_v43 = vmul.f32 %v1211_v2, %v240_v38  ;;  %v280_v45 = vmul.f32 %v1211_v2, %v241_v39  ;;  %v250_v6 = vld [vmem:[%s1218_s28 + $0xa8] sm:$0xff]  ;;  %v251_v17 = vld [vmem:[%s1218_s28 + $0xb0] sm:$0xff]  ;;  %v252_v18 = vld [vmem:[%s1218_s28 + $0xb8] sm:$0xff] }
  0x18   : > { %1081 = vmatmul.mubr.msk.bf16.vlgmr.msra.gmra.mrb[0].mxu0 %vm360_vm1, %v337_v31  ;;  %v339_v41 = vpack.c.bf16 %v1275_v34, %v1272_v33  ;;  %v281_v46 = vmul.f32 %v1211_v2, %v242_v40  ;;  %v1298_v47 = vadd.f32 %v1223_v3, %v278_v42  ;;  %v282_v56 = vmul.f32 %v1211_v2, %v243_v51  ;;  %v253_v22 = vld [vmem:[%s1218_s28 + $0xc0] sm:$0xff]  ;;  %v254_v23 = vld [vmem:[%s1218_s28 + $0xc8] sm:$0xff]  ;;  %v256_v42 = vld [vmem:[%s1218_s28 + $0xd8] sm:$0xff] }
  0x19   : > { %1084 = vmatprep.mubr.msk.bf16.mxu0 %vm360_vm1, %v338_v32  ;;  %v340_v44 = vpack.c.bf16 %v1282_v36, %v1279_v35  ;;  %v1301_v48 = vadd.f32 %v1223_v3, %v279_v43  ;;  %v1305_v49 = vadd.f32 %v1223_v3, %v280_v45  ;;  %v283_v57 = vmul.f32 %v1211_v2, %v244_v52  ;;  %v257_v43 = vld [vmem:[%s1218_s28 + $0xe0] sm:$0xff] }
  0x1a   : > { %v1308_v50 = vadd.f32 %v1223_v3, %v281_v46  ;;  %v284_v59 = vmul.f32 %v1211_v2, %v245_v53  ;;  %v285_v60 = vmul.f32 %v1211_v2, %v246_v54  ;;  %v1324_v61 = vadd.f32 %v1223_v3, %v282_v56 }
  0x1b   : > { %v341_v55 = vpack.c.bf16 %v1301_v48, %v1298_v47  ;;  %v1327_v62 = vadd.f32 %v1223_v3, %v283_v57  ;;  %v286_v8 = vmul.f32 %v1211_v2, %v247_v1  ;;  %v287_v9 = vmul.f32 %v1211_v2, %v248_v4 }
  0x1c   : > { %v342_v58 = vpack.c.bf16 %v1308_v50, %v1305_v49  ;;  %v1331_v63 = vadd.f32 %v1223_v3, %v284_v59  ;;  %v1334_v0 = vadd.f32 %v1223_v3, %v285_v60  ;;  %v288_v11 = vmul.f32 %v1211_v2, %v249_v5  ;;  %v259_v59 = vld [vmem:[%s1218_s28 + $0xf0] sm:$0xff]  ;;  %v260_v60 = vld [vmem:[%s1218_s28 + $0xf8] sm:$0xff] }
  0x1d   : > { %v343_v7 = vpack.c.bf16 %v1327_v62, %v1324_v61  ;;  %v289_v12 = vmul.f32 %v1211_v2, %v250_v6  ;;  %v1350_v13 = vadd.f32 %v1223_v3, %v286_v8  ;;  %v1353_v14 = vadd.f32 %v1223_v3, %v287_v9 }
  0x1e   : > { %v344_v10 = vpack.c.bf16 %v1334_v0, %v1331_v63  ;;  %v1357_v15 = vadd.f32 %v1223_v3, %v288_v11  ;;  %v290_v28 = vmul.f32 %v1211_v2, %v251_v17  ;;  %v291_v29 = vmul.f32 %v1211_v2, %v252_v18 }
  0x1f   : > { %v1360_v16 = vadd.f32 %v1223_v3, %v289_v12  ;;  %v345_v27 = vpack.c.bf16 %v1353_v14, %v1350_v13  ;;  %v292_v31 = vmul.f32 %v1211_v2, %v253_v22  ;;  %v293_v32 = vmul.f32 %v1211_v2, %v254_v23 }
  0x20   : > { %1085 = vmatmul.mubr.msk.bf16.gmra.mrb[4].mxu0 %vm360_vm1, %v339_v41  ;;  %v1376_v37 = vadd.f32 %v1223_v3, %v290_v28  ;;  %v1379_v38 = vadd.f32 %v1223_v3, %v291_v29  ;;  %v255_v41 = vld [vmem:[%s1218_s28 + $0xd0] sm:$0xff]  ;;  %v295_v51 = vmul.f32 %v1211_v2, %v256_v42  ;;  %v296_v53 = vmul.f32 %v1211_v2, %v257_v43 }
  0x21   : > { %1088 = vmatprep.mubr.msk.bf16.mxu0 %vm360_vm1, %v340_v44  ;;  %v346_v30 = vpack.c.bf16 %v1360_v16, %v1357_v15  ;;  %v1383_v39 = vadd.f32 %v1223_v3, %v292_v31  ;;  %v1386_v40 = vadd.f32 %v1223_v3, %v293_v32  ;;  %v258_v44 = vld [vmem:[%s1218_s28 + $0xe8] sm:$0xff]  ;;  %v294_v46 = vmul.f32 %v1211_v2, %v255_v41 }
  0x22   : > { %v347_v45 = vpack.c.bf16 %v1379_v38, %v1376_v37  ;;  %v297_v54 = vmul.f32 %v1211_v2, %v258_v44  ;;  %v1405_v56 = vadd.f32 %v1223_v3, %v295_v51  ;;  %v1409_v57 = vadd.f32 %v1223_v3, %v296_v53 }
  0x23   : > { %v348_v52 = vpack.c.bf16 %v1386_v40, %v1383_v39  ;;  %v298_v4 = vmul.f32 %v1211_v2, %v259_v59  ;;  %v299_v5 = vmul.f32 %v1211_v2, %v260_v60  ;;  %v1155_v2 = vld [vmem:[%s1636_s4] sm:$0xff]  }
  0x24   : > { %1112 = vmatprep.subr.bf16.mxu1 %v1155_v2 }
  0x25   : > { %v1427_v8 = vadd.f32 %v1223_v3, %v299_v5  ;;  %1113 = vmatpush3.bf16.msra.mxu1 %v1155_v2 }
  0x28   : > { %1089 = vmatmul.mubr.msk.bf16.gmra.mrb[8].mxu0 %vm360_vm1, %v341_v55  ;;  %v1402_v55 = vadd.f32 %v1223_v3, %v294_v46 }
  0x29   : > { %1092 = vmatprep.mubr.msk.bf16.mxu0 %vm360_vm1, %v342_v58  ;;  %v1412_v58 = vadd.f32 %v1223_v3, %v297_v54 }
  0x2a   : > { %v349_v1 = vpack.c.bf16 %v1405_v56, %v1402_v55 }
  0x2b   : > { %v350_v6 = vpack.c.bf16 %v1412_v58, %v1409_v57 }
  0x30   : > { %1093 = vmatmul.mubr.msk.bf16.gmra.mrb[12].mxu0 %vm360_vm1, %v343_v7  ;;  %v1424_v7 = vadd.f32 %v1223_v3, %v298_v4 }
  0x31   : > { %1096 = vmatprep.mubr.msk.bf16.mxu0 %vm360_vm1, %v344_v10  ;;  %v1439_v10 = vld [vmem:[%s1634_s2] ss:$0 sm:$0xff] }
  0x32   : > { %v351_v9 = vpack.c.bf16 %v1427_v8, %v1424_v7 }
  0x38   : > { %1097 = vmatmul.mubr.msk.bf16.gmra.mrb[16].mxu0 %vm360_vm1, %v345_v27 }
  0x39   : > { %1100 = vmatprep.mubr.msk.bf16.mxu0 %vm360_vm1, %v346_v30 }
  0x40   : > { %1101 = vmatmul.mubr.msk.bf16.gmra.mrb[20].mxu0 %vm360_vm1, %v347_v45 }
  0x41   : > { %1104 = vmatprep.mubr.msk.bf16.mxu0 %vm360_vm1, %v348_v52 }
  0x48   : > { %1105 = vmatmul.mubr.msk.bf16.gmra.mrb[24].mxu0 %vm360_vm1, %v349_v1 }
  0x49   : > { %1108 = vmatprep.mubr.msk.bf16.mxu0 %vm360_vm1, %v350_v6 }
  0x50   : > { %1109 = vmatmul.mubr.msk.bf16.gmra.mrb[28].mxu0 %vm360_vm1, %v351_v9 }
  0xeb   : > { %v1082_v3 = vpop.f32.mrb[0].mxu0 }
  0xec   : > { %v456_v11 = vadd.f32 %v1082_v3, %v1439_v10  ;;  %v447_v12 = vpop.f32.mrb[1].mxu0 }
  0xed   : > { %v448_v17 = vadd.f32 %v1439_v10, %v447_v12  ;;  %v1083_v18 = vpop.f32.mrb[2].mxu0 }
  0xee   : > { %v459_v22 = vadd.f32 %v1083_v18, %v1439_v10  ;;  %v450_v23 = vpop.f32.mrb[3].mxu0  ;;  %v576_v28 = vmax.f32 %v456_v11, 0.0 }
  0xef   : > { %v451_v27 = vadd.f32 %v1439_v10, %v450_v23  ;;  %v574_v30 = vmax.f32 %v448_v17, 0.0 }
  0xf0   : > { %v577_v29 = vmax.f32 %v459_v22, 0.0 }
  0xf1   : > { %v575_v31 = vmax.f32 %v451_v27, 0.0 }
  0xf2   : > { %v607_v32 = vpack.c.bf16 %v577_v29, %v576_v28 }
  0xf3   : > { %v1086_v41 = vpop.f32.mrb[4].mxu0  ;;  %v606_v42 = vpack.c.bf16 %v575_v31, %v574_v30 }
  0xf4   : > { %v472_v43 = vadd.f32 %v1086_v41, %v1439_v10  ;;  %v463_v44 = vpop.f32.mrb[5].mxu0 }
  0xf5   : > { %v464_v45 = vadd.f32 %v1439_v10, %v463_v44  ;;  %v1087_v46 = vpop.f32.mrb[6].mxu0  ;;  %1114 = vmatprep.mubr.msk.bf16.mxu1 %vm630_vm2, %v606_v42 }
  0xf6   : > { %v475_v51 = vadd.f32 %v1087_v46, %v1439_v10  ;;  %v466_v52 = vpop.f32.mrb[7].mxu0  ;;  %1115 = vmatmul.mubr.msk.bf16.vlgmr.msra.gmra.mrb[0].mxu1 %vm630_vm2, %v607_v32  ;;  %v580_v54 = vmax.f32 %v472_v43, 0.0 }
  0xf7   : > { %v467_v53 = vadd.f32 %v1439_v10, %v466_v52  ;;  %v578_v60 = vmax.f32 %v464_v45, 0.0 }
  0xf8   : > { %v581_v59 = vmax.f32 %v475_v51, 0.0 }
  0xf9   : > { %v579_v1 = vmax.f32 %v467_v53, 0.0 }
  0xfa   : > { %v609_v4 = vpack.c.bf16 %v581_v59, %v580_v54 }
  0xfb   : > { %v608_v5 = vpack.c.bf16 %v579_v1, %v578_v60  ;;  %v1090_v6 = vpop.f32.mrb[8].mxu0 }
  0xfc   : > { %v488_v9 = vadd.f32 %v1090_v6, %v1439_v10  ;;  %v479_v2 = vpop.f32.mrb[9].mxu0 }
  0xfd   : > { %v480_v3 = vadd.f32 %v1439_v10, %v479_v2  ;;  %v1091_v11 = vpop.f32.mrb[10].mxu0  ;;  %1118 = vmatprep.mubr.msk.bf16.mxu1 %vm630_vm2, %v608_v5 }
  0xfe   : > { %v491_v12 = vadd.f32 %v1091_v11, %v1439_v10  ;;  %v482_v17 = vpop.f32.mrb[11].mxu0  ;;  %1119 = vmatmul.mubr.msk.bf16.gmra.mrb[4].mxu1 %vm630_vm2, %v609_v4  ;;  %v584_v22 = vmax.f32 %v488_v9, 0.0 }
  0xff   : > { %v483_v18 = vadd.f32 %v1439_v10, %v482_v17  ;;  %v582_v27 = vmax.f32 %v480_v3, 0.0 }
 0x100   : > { %v585_v23 = vmax.f32 %v491_v12, 0.0 }
 0x101   : > { %v583_v28 = vmax.f32 %v483_v18, 0.0 }
 0x102   : > { %v611_v29 = vpack.c.bf16 %v585_v23, %v584_v22 }
 0x103   : > { %v610_v30 = vpack.c.bf16 %v583_v28, %v582_v27  ;;  %v1094_v31 = vpop.f32.mrb[12].mxu0 }
 0x104   : > { %v504_v32 = vadd.f32 %v1094_v31, %v1439_v10  ;;  %v495_v41 = vpop.f32.mrb[13].mxu0 }
 0x105   : > { %v496_v42 = vadd.f32 %v1439_v10, %v495_v41  ;;  %v1095_v43 = vpop.f32.mrb[14].mxu0  ;;  %1122 = vmatprep.mubr.msk.bf16.mxu1 %vm630_vm2, %v610_v30 }
 0x106   : > { %v507_v44 = vadd.f32 %v1095_v43, %v1439_v10  ;;  %v498_v45 = vpop.f32.mrb[15].mxu0  ;;  %1123 = vmatmul.mubr.msk.bf16.gmra.mrb[8].mxu1 %vm630_vm2, %v611_v29  ;;  %v588_v51 = vmax.f32 %v504_v32, 0.0 }
 0x107   : > { %v499_v46 = vadd.f32 %v1439_v10, %v498_v45  ;;  %v586_v53 = vmax.f32 %v496_v42, 0.0 }
 0x108   : > { %v589_v52 = vmax.f32 %v507_v44, 0.0 }
 0x109   : > { %v587_v54 = vmax.f32 %v499_v46, 0.0 }
 0x10a   : > { %v613_v59 = vpack.c.bf16 %v589_v52, %v588_v51 }
 0x10b   : > { %v612_v60 = vpack.c.bf16 %v587_v54, %v586_v53  ;;  %v1098_v1 = vpop.f32.mrb[16].mxu0 }
 0x10c   : > { %v520_v4 = vadd.f32 %v1098_v1, %v1439_v10  ;;  %v511_v5 = vpop.f32.mrb[17].mxu0 }
 0x10d   : > { %v512_v6 = vadd.f32 %v1439_v10, %v511_v5  ;;  %v1099_v9 = vpop.f32.mrb[18].mxu0  ;;  %1126 = vmatprep.mubr.msk.bf16.mxu1 %vm630_vm2, %v612_v60 }
 0x10e   : > { %v523_v2 = vadd.f32 %v1099_v9, %v1439_v10  ;;  %v514_v3 = vpop.f32.mrb[19].mxu0  ;;  %1127 = vmatmul.mubr.msk.bf16.gmra.mrb[12].mxu1 %vm630_vm2, %v613_v59  ;;  %v592_v12 = vmax.f32 %v520_v4, 0.0 }
 0x10f   : > { %v515_v11 = vadd.f32 %v1439_v10, %v514_v3  ;;  %v590_v18 = vmax.f32 %v512_v6, 0.0 }
 0x110   : > { %v593_v17 = vmax.f32 %v523_v2, 0.0 }
 0x111   : > { %v591_v22 = vmax.f32 %v515_v11, 0.0 }
 0x112   : > { %v615_v23 = vpack.c.bf16 %v593_v17, %v592_v12 }
 0x113   : > { %v614_v27 = vpack.c.bf16 %v591_v22, %v590_v18  ;;  %v1102_v28 = vpop.f32.mrb[20].mxu0 }
 0x114   : > { %v536_v29 = vadd.f32 %v1102_v28, %v1439_v10  ;;  %v527_v30 = vpop.f32.mrb[21].mxu0 }
 0x115   : > { %v528_v31 = vadd.f32 %v1439_v10, %v527_v30  ;;  %v1103_v32 = vpop.f32.mrb[22].mxu0  ;;  %1130 = vmatprep.mubr.msk.bf16.mxu1 %vm630_vm2, %v614_v27 }
 0x116   : > { %v539_v41 = vadd.f32 %v1103_v32, %v1439_v10  ;;  %v530_v42 = vpop.f32.mrb[23].mxu0  ;;  %1131 = vmatmul.mubr.msk.bf16.gmra.mrb[16].mxu1 %vm630_vm2, %v615_v23  ;;  %v596_v44 = vmax.f32 %v536_v29, 0.0 }
 0x117   : > { %v531_v43 = vadd.f32 %v1439_v10, %v530_v42  ;;  %v594_v46 = vmax.f32 %v528_v31, 0.0 }
 0x118   : > { %v597_v45 = vmax.f32 %v539_v41, 0.0 }
 0x119   : > { %v595_v51 = vmax.f32 %v531_v43, 0.0 }
 0x11a   : > { %v617_v52 = vpack.c.bf16 %v597_v45, %v596_v44 }
 0x11b   : > { %v616_v53 = vpack.c.bf16 %v595_v51, %v594_v46  ;;  %v1106_v54 = vpop.f32.mrb[24].mxu0  ;;  %v1492_v51 = vld [vmem:[%s1633_s1 + $0x2] ss:$0 sm:$0xff] }
 0x11c   : > { %v552_v59 = vadd.f32 %v1106_v54, %v1439_v10  ;;  %v543_v60 = vpop.f32.mrb[25].mxu0 }
 0x11d   : > { %v544_v1 = vadd.f32 %v1439_v10, %v543_v60  ;;  %v1107_v4 = vpop.f32.mrb[26].mxu0  ;;  %1134 = vmatprep.mubr.msk.bf16.mxu1 %vm630_vm2, %v616_v53 }
 0x11e   : > { %v555_v5 = vadd.f32 %v1107_v4, %v1439_v10  ;;  %v546_v6 = vpop.f32.mrb[27].mxu0  ;;  %1135 = vmatmul.mubr.msk.bf16.gmra.mrb[20].mxu1 %vm630_vm2, %v617_v52  ;;  %v600_v2 = vmax.f32 %v552_v59, 0.0 }
 0x11f   : > { %v547_v9 = vadd.f32 %v1439_v10, %v546_v6  ;;  %v598_v11 = vmax.f32 %v544_v1, 0.0 }
 0x120   : > { %v601_v3 = vmax.f32 %v555_v5, 0.0 }
 0x121   : > { %v599_v12 = vmax.f32 %v547_v9, 0.0 }
 0x122   : > { %v619_v17 = vpack.c.bf16 %v601_v3, %v600_v2 }
 0x123   : > { %v618_v18 = vpack.c.bf16 %v599_v12, %v598_v11  ;;  %v1110_v22 = vpop.f32.mrb[28].mxu0 }
 0x124   : > { %v568_v23 = vadd.f32 %v1110_v22, %v1439_v10  ;;  %v559_v27 = vpop.f32.mrb[29].mxu0 }
 0x125   : > { %v560_v28 = vadd.f32 %v1439_v10, %v559_v27  ;;  %v1111_v29 = vpop.f32.mrb[30].mxu0  ;;  %1138 = vmatprep.mubr.msk.bf16.mxu1 %vm630_vm2, %v618_v18 }
 0x126   : > { %v571_v30 = vadd.f32 %v1111_v29, %v1439_v10  ;;  %v562_v31 = vpop.f32.mrb[31].mxu0  ;;  %1139 = vmatmul.mubr.msk.bf16.gmra.mrb[24].mxu1 %vm630_vm2, %v619_v17  ;;  %v604_v41 = vmax.f32 %v568_v23, 0.0 }
 0x127   : > { %v563_v32 = vadd.f32 %v1439_v10, %v562_v31  ;;  %v602_v43 = vmax.f32 %v560_v28, 0.0 }
 0x128   : > { %v605_v42 = vmax.f32 %v571_v30, 0.0 }
 0x129   : > { %v603_v44 = vmax.f32 %v563_v32, 0.0 }
 0x12a   : > { %v621_v45 = vpack.c.bf16 %v605_v42, %v604_v41 }
 0x12b   : > { %v620_v46 = vpack.c.bf16 %v603_v44, %v602_v43 }
 0x12d   : > { %1142 = vmatprep.mubr.msk.bf16.mxu1 %vm630_vm2, %v620_v46 }
 0x12e   : > { %1143 = vmatmul.mubr.msk.bf16.gmra.mrb[28].mxu1 %vm630_vm2, %v621_v45 }
 0x1c9   : > { %v1116_v52 = vpop.f32.mrb[0].mxu1 }
 0x1ca   : > { %v842_v53 = vadd.f32 %v1116_v52, %v1247_v21  ;;  %v713_v54 = vpop.f32.mrb[1].mxu1 }
 0x1cb   : > { %v840_v10 = vadd.f32 %v713_v54, %v1241_v19  ;;  %v1117_v59 = vpop.f32.mrb[2].mxu1 }
 0x1cc   : > { %v878_v60 = vadd.f32 %v1492_v51, %v842_v53  ;;  %v843_v1 = vadd.f32 %v1117_v59, %v1252_v24  ;;  %v716_v4 = vpop.f32.mrb[3].mxu1 }
 0x1cd   : > { %v876_v21 = vadd.f32 %v1492_v51, %v840_v10  ;;  %v841_v5 = vadd.f32 %v716_v4, %v1244_v20 }
 0x1ce   : > { %910 = vst.msk [vmem:[%s1500_s14 + $0x10] sm:$0xff] %vm360_vm1, %v878_v60  ;;  %v879_v6 = vadd.f32 %v1492_v51, %v843_v1 }
 0x1cf   : > { %908 = vst.msk [vmem:[%s1500_s14] sm:$0xff] %vm360_vm1, %v876_v21  ;;  %v877_v19 = vadd.f32 %v1492_v51, %v841_v5 }
 0x1d0   : > { %911 = vst.msk [vmem:[%s1500_s14 + $0x18] sm:$0xff] %vm360_vm1, %v879_v6 }
 0x1d1   : > { %909 = vst.msk [vmem:[%s1500_s14 + $0x8] sm:$0xff] %vm360_vm1, %v877_v19  ;;  %v1120_v24 = vpop.f32.mrb[4].mxu1 }
 0x1d2   : > { %v846_v9 = vadd.f32 %v1120_v24, %v1272_v33  ;;  %v729_v20 = vpop.f32.mrb[5].mxu1 }
 0x1d3   : > { %v844_v2 = vadd.f32 %v729_v20, %v1255_v25  ;;  %v1121_v3 = vpop.f32.mrb[6].mxu1 }
 0x1d4   : > { %v882_v11 = vadd.f32 %v1492_v51, %v846_v9  ;;  %v847_v12 = vadd.f32 %v1121_v3, %v1275_v34  ;;  %v732_v17 = vpop.f32.mrb[7].mxu1 }
 0x1d5   : > { %v880_v18 = vadd.f32 %v1492_v51, %v844_v2  ;;  %v845_v22 = vadd.f32 %v732_v17, %v1258_v26 }
 0x1d6   : > { %914 = vst.msk [vmem:[%s1500_s14 + $0x30] sm:$0xff] %vm360_vm1, %v882_v11  ;;  %v883_v23 = vadd.f32 %v1492_v51, %v847_v12 }
 0x1d7   : > { %912 = vst.msk [vmem:[%s1500_s14 + $0x20] sm:$0xff] %vm360_vm1, %v880_v18  ;;  %v881_v25 = vadd.f32 %v1492_v51, %v845_v22 }
 0x1d8   : > { %915 = vst.msk [vmem:[%s1500_s14 + $0x38] sm:$0xff] %vm360_vm1, %v883_v23 }
 0x1d9   : > { %913 = vst.msk [vmem:[%s1500_s14 + $0x28] sm:$0xff] %vm360_vm1, %v881_v25  ;;  %v1124_v33 = vpop.f32.mrb[8].mxu1 }
 0x1da   : > { %v850_v34 = vadd.f32 %v1124_v33, %v1298_v47  ;;  %v745_v26 = vpop.f32.mrb[9].mxu1 }
 0x1db   : > { %v848_v27 = vadd.f32 %v745_v26, %v1279_v35  ;;  %v1125_v28 = vpop.f32.mrb[10].mxu1 }
 0x1dc   : > { %v886_v29 = vadd.f32 %v1492_v51, %v850_v34  ;;  %v851_v30 = vadd.f32 %v1125_v28, %v1301_v48  ;;  %v748_v31 = vpop.f32.mrb[11].mxu1 }
 0x1dd   : > { %v884_v32 = vadd.f32 %v1492_v51, %v848_v27  ;;  %v849_v41 = vadd.f32 %v748_v31, %v1282_v36 }
 0x1de   : > { %918 = vst.msk [vmem:[%s1500_s14 + $0x50] sm:$0xff] %vm360_vm1, %v886_v29  ;;  %v887_v42 = vadd.f32 %v1492_v51, %v851_v30 }
 0x1df   : > { %916 = vst.msk [vmem:[%s1500_s14 + $0x40] sm:$0xff] %vm360_vm1, %v884_v32  ;;  %v885_v35 = vadd.f32 %v1492_v51, %v849_v41 }
 0x1e0   : > { %919 = vst.msk [vmem:[%s1500_s14 + $0x58] sm:$0xff] %vm360_vm1, %v887_v42 }
 0x1e1   : > { %917 = vst.msk [vmem:[%s1500_s14 + $0x48] sm:$0xff] %vm360_vm1, %v885_v35  ;;  %v1128_v47 = vpop.f32.mrb[12].mxu1 }
 0x1e2   : > { %v854_v48 = vadd.f32 %v1128_v47, %v1324_v61  ;;  %v761_v36 = vpop.f32.mrb[13].mxu1 }
 0x1e3   : > { %v852_v43 = vadd.f32 %v761_v36, %v1305_v49  ;;  %v1129_v44 = vpop.f32.mrb[14].mxu1 }
 0x1e4   : > { %v890_v45 = vadd.f32 %v1492_v51, %v854_v48  ;;  %v855_v46 = vadd.f32 %v1129_v44, %v1327_v62  ;;  %v764_v52 = vpop.f32.mrb[15].mxu1 }
 0x1e5   : > { %v888_v53 = vadd.f32 %v1492_v51, %v852_v43  ;;  %v853_v54 = vadd.f32 %v764_v52, %v1308_v50 }
 0x1e6   : > { %922 = vst.msk [vmem:[%s1500_s14 + $0x70] sm:$0xff] %vm360_vm1, %v890_v45  ;;  %v891_v10 = vadd.f32 %v1492_v51, %v855_v46 }
 0x1e7   : > { %920 = vst.msk [vmem:[%s1500_s14 + $0x60] sm:$0xff] %vm360_vm1, %v888_v53  ;;  %v889_v49 = vadd.f32 %v1492_v51, %v853_v54 }
 0x1e8   : > { %923 = vst.msk [vmem:[%s1500_s14 + $0x78] sm:$0xff] %vm360_vm1, %v891_v10 }
 0x1e9   : > { %921 = vst.msk [vmem:[%s1500_s14 + $0x68] sm:$0xff] %vm360_vm1, %v889_v49  ;;  %v1132_v61 = vpop.f32.mrb[16].mxu1 }
 0x1ea   : > { %v858_v62 = vadd.f32 %v1132_v61, %v1350_v13  ;;  %v777_v50 = vpop.f32.mrb[17].mxu1 }
 0x1eb   : > { %v856_v59 = vadd.f32 %v777_v50, %v1331_v63  ;;  %v1133_v60 = vpop.f32.mrb[18].mxu1 }
 0x1ec   : > { %v894_v1 = vadd.f32 %v1492_v51, %v858_v62  ;;  %v859_v4 = vadd.f32 %v1133_v60, %v1353_v14  ;;  %v780_v21 = vpop.f32.mrb[19].mxu1 }
 0x1ed   : > { %v892_v5 = vadd.f32 %v1492_v51, %v856_v59  ;;  %v857_v6 = vadd.f32 %v780_v21, %v1334_v0 }
 0x1ee   : > { %926 = vst.msk [vmem:[%s1500_s14 + $0x90] sm:$0xff] %vm360_vm1, %v894_v1  ;;  %v895_v19 = vadd.f32 %v1492_v51, %v859_v4 }
 0x1ef   : > { %924 = vst.msk [vmem:[%s1500_s14 + $0x80] sm:$0xff] %vm360_vm1, %v892_v5  ;;  %v893_v63 = vadd.f32 %v1492_v51, %v857_v6 }
 0x1f0   : > { %927 = vst.msk [vmem:[%s1500_s14 + $0x98] sm:$0xff] %vm360_vm1, %v895_v19 }
 0x1f1   : > { %925 = vst.msk [vmem:[%s1500_s14 + $0x88] sm:$0xff] %vm360_vm1, %v893_v63  ;;  %v1136_v13 = vpop.f32.mrb[20].mxu1 }
 0x1f2   : > { %v862_v14 = vadd.f32 %v1136_v13, %v1376_v37  ;;  %v793_v0 = vpop.f32.mrb[21].mxu1 }
 0x1f3   : > { %v860_v24 = vadd.f32 %v793_v0, %v1357_v15  ;;  %v1137_v9 = vpop.f32.mrb[22].mxu1 }
 0x1f4   : > { %v898_v20 = vadd.f32 %v1492_v51, %v862_v14  ;;  %v863_v2 = vadd.f32 %v1137_v9, %v1379_v38  ;;  %v796_v3 = vpop.f32.mrb[23].mxu1 }
 0x1f5   : > { %v896_v11 = vadd.f32 %v1492_v51, %v860_v24  ;;  %v861_v12 = vadd.f32 %v796_v3, %v1360_v16 }
 0x1f6   : > { %930 = vst.msk [vmem:[%s1500_s14 + $0xb0] sm:$0xff] %vm360_vm1, %v898_v20  ;;  %v899_v17 = vadd.f32 %v1492_v51, %v863_v2 }
 0x1f7   : > { %928 = vst.msk [vmem:[%s1500_s14 + $0xa0] sm:$0xff] %vm360_vm1, %v896_v11  ;;  %v897_v15 = vadd.f32 %v1492_v51, %v861_v12 }
 0x1f8   : > { %931 = vst.msk [vmem:[%s1500_s14 + $0xb8] sm:$0xff] %vm360_vm1, %v899_v17 }
 0x1f9   : > { %929 = vst.msk [vmem:[%s1500_s14 + $0xa8] sm:$0xff] %vm360_vm1, %v897_v15  ;;  %v1140_v37 = vpop.f32.mrb[24].mxu1 }
 0x1fa   : > { %v866_v38 = vadd.f32 %v1140_v37, %v1402_v55  ;;  %v809_v16 = vpop.f32.mrb[25].mxu1 }
 0x1fb   : > { %v864_v18 = vadd.f32 %v809_v16, %v1383_v39  ;;  %v1141_v22 = vpop.f32.mrb[26].mxu1 }
 0x1fc   : > { %v902_v23 = vadd.f32 %v1492_v51, %v866_v38  ;;  %v867_v25 = vadd.f32 %v1141_v22, %v1405_v56  ;;  %v812_v33 = vpop.f32.mrb[27].mxu1 }
 0x1fd   : > { %v900_v34 = vadd.f32 %v1492_v51, %v864_v18  ;;  %v865_v26 = vadd.f32 %v812_v33, %v1386_v40 }
 0x1fe   : > { %934 = vst.msk [vmem:[%s1500_s14 + $0xd0] sm:$0xff] %vm360_vm1, %v902_v23  ;;  %v903_v27 = vadd.f32 %v1492_v51, %v867_v25 }
 0x1ff   : > { %932 = vst.msk [vmem:[%s1500_s14 + $0xc0] sm:$0xff] %vm360_vm1, %v900_v34  ;;  %v901_v39 = vadd.f32 %v1492_v51, %v865_v26 }
 0x200   : > { %935 = vst.msk [vmem:[%s1500_s14 + $0xd8] sm:$0xff] %vm360_vm1, %v903_v27 }
 0x201   : > { %933 = vst.msk [vmem:[%s1500_s14 + $0xc8] sm:$0xff] %vm360_vm1, %v901_v39  ;;  %v1144_v55 = vpop.f32.mrb[28].mxu1 }
 0x202   : > { %v870_v56 = vadd.f32 %v1144_v55, %v1424_v7  ;;  %v825_v40 = vpop.f32.mrb[29].mxu1 }
 0x203   : > { %v868_v28 = vadd.f32 %v825_v40, %v1409_v57  ;;  %v1145_v29 = vpop.f32.mrb[30].mxu1 }
 0x204   : > { %v906_v30 = vadd.f32 %v1492_v51, %v870_v56  ;;  %v871_v31 = vadd.f32 %v1145_v29, %v1427_v8  ;;  %v828_v32 = vpop.f32.mrb[31].mxu1 }
 0x205   : > { %v904_v41 = vadd.f32 %v1492_v51, %v868_v28  ;;  %v869_v42 = vadd.f32 %v828_v32, %v1412_v58 }
 0x206   : > { %938 = vst.msk [vmem:[%s1500_s14 + $0xf0] sm:$0xff] %vm360_vm1, %v906_v30  ;;  %v907_v35 = vadd.f32 %v1492_v51, %v871_v31 }
 0x207   : > { %936 = vst.msk [vmem:[%s1500_s14 + $0xe0] sm:$0xff] %vm360_vm1, %v904_v41  ;;  %v905_v7 = vadd.f32 %v1492_v51, %v869_v42 }
 0x208   : > { %939 = vst.msk [vmem:[%s1500_s14 + $0xf8] sm:$0xff] %vm360_vm1, %v907_v35 }
 0x209   : > { %937 = vst.msk [vmem:[%s1500_s14 + $0xe8] sm:$0xff] %vm360_vm1, %v905_v7 }
 0x20a PF: > { %s15_s18 = sadd.s32 1, %s1162_s18  }
 0x20b   : > { %p12_p4 = scmp.ge.s32.totalorder %s15_s18, 4  }
 0x20d   :  { %14 = sbr.rel (!%p12_p4) target bundleno = 1 (0x1), region = 70 }

</bundles_post_ra>
